<compile_context>
chip_gen: v5e
topology: v5e:2x2
jax: 0.10.0
libtpu: 0.0.40
codegen_flags: <defaults>
</compile_context>

<pallas_src>
import jax
import jax.numpy as jnp
from jax.experimental import pallas as pl
from jax.experimental.pallas import tpu as pltpu


def mlp_kernel(x_ref, w1_ref, w2_ref, b2_ref, w3_ref, b3_ref, o_ref):
    # x_ref: (8, TB)  rows 0..6 = features, row 7 = ones (layer-1 bias fold)
    x = x_ref[...]
    # Layer 1: (16, 8) @ (8, TB) -> (16, TB), bias already folded into W1.
    h1 = jnp.maximum(
        jnp.dot(w1_ref[...], x, preferred_element_type=jnp.float32), 0.0)
    # Layer 2: (8, 16) @ (16, TB) + (8, 1) -> (8, TB)
    h2 = jnp.maximum(
        jnp.dot(w2_ref[...], h1, preferred_element_type=jnp.float32)
        + b2_ref[...], 0.0)
    # Layer 3: (3, 8) @ (8, TB) + (3, 1) -> (3, TB)
    z = (jnp.dot(w3_ref[...], h2, preferred_element_type=jnp.float32)
         + b3_ref[...])
    o_ref[...] = jax.nn.sigmoid(z)


def neuronet_forward(x, params, *, tb=128):
    """x: (batch, 7) float32.  params in PyTorch layout: w (out,in), b (out,)."""
    w1, b1, w2, b2, w3, b3 = params
    batch = x.shape[0]

    # --- wrapper-side layout plumbing (cheap, done once per call) -----------
    n_tiles = pl.cdiv(batch, tb)
    b_pad = n_tiles * tb

    # Feature-major x, augmented with a ones row for the layer-1 bias fold.
    x_t = jnp.zeros((8, b_pad), jnp.float32)
    x_t = x_t.at[:7, :batch].set(x.T.astype(jnp.float32))
    x_t = x_t.at[7, :batch].set(1.0)

    w1_aug = jnp.concatenate([w1, b1[:, None]], axis=1)   # (16, 8)
    b2_col = b2[:, None]                                  # (8, 1)
    b3_col = b3[:, None]                                  # (3, 1)

    const = lambda shape: pl.BlockSpec(shape, lambda i: (0, 0))

    out = pl.pallas_call(
        mlp_kernel,
        out_shape=jax.ShapeDtypeStruct((3, b_pad), jnp.float32),
        grid=(n_tiles,),
        in_specs=[
            pl.BlockSpec((8, tb), lambda i: (0, i)),   # x tile moves with grid
            const(w1_aug.shape),                       # weights stay resident
            const(w2.shape),
            const(b2_col.shape),
            const(w3.shape),
            const(b3_col.shape),
        ],
        out_specs=pl.BlockSpec((3, tb), lambda i: (0, i)),
        compiler_params=pltpu.CompilerParams(
            dimension_semantics=("parallel",)),
    )(x_t, w1_aug, w2, b2_col, w3, b3_col)

    # Back to PyTorch's (batch, 3) row-major layout, dropping batch padding.
    return out[:, :batch].T


def init_params(key):
    """Deterministic init matching PyTorch nn.Linear default (U[-1/sqrt(fan_in), +])."""
    def linear(k, fan_in, fan_out):
        kw, kb = jax.random.split(k)
        bound = 1.0 / jnp.sqrt(fan_in)
        w = jax.random.uniform(kw, (fan_out, fan_in), jnp.float32, -bound, bound)
        b = jax.random.uniform(kb, (fan_out,), jnp.float32, -bound, bound)
        return w, b

    k1, k2, k3 = jax.random.split(key, 3)
    w1, b1 = linear(k1, 7, 16)
    w2, b2 = linear(k2, 16, 8)
    w3, b3 = linear(k3, 8, 3)
    return w1, b1, w2, b2, w3, b3


def reference_forward(x, params):
    """Pure-JAX reference of NeuroNet.forward."""
    w1, b1, w2, b2, w3, b3 = params
    h = jnp.maximum(x @ w1.T + b1, 0.0)
    h = jnp.maximum(h @ w2.T + b2, 0.0)
    return jax.nn.sigmoid(h @ w3.T + b3)


if __name__ == "__main__":
    key = jax.random.PRNGKey(0)
    kx, kp = jax.random.split(key)
    params = init_params(kp)

    # Small primary test (single grid step) + a ragged multi-step test.
    for batch in (8, 300):
        x = jax.random.normal(jax.random.fold_in(kx, batch), (batch, 7),
                              dtype=jnp.float32)
        out = jax.block_until_ready(neuronet_forward(x, params, tb=128))
        ref = reference_forward(x, params)
        assert out.shape == (batch, 3)
        assert jnp.allclose(out, ref, atol=1e-5, rtol=1e-5)

    print("KERNEL_OK")
</pallas_src>

<mosaic_0001>
module attributes {stable_mosaic.version = 11 : i64} {
  func.func @mlp_kernel(%arg0: i32, %arg1: memref<8x128xf32, #tpu.memory_space<vmem>>, %arg2: memref<16x8xf32, #tpu.memory_space<vmem>>, %arg3: memref<8x16xf32, #tpu.memory_space<vmem>>, %arg4: memref<8x1xf32, #tpu.memory_space<vmem>>, %arg5: memref<3x8xf32, #tpu.memory_space<vmem>>, %arg6: memref<3x1xf32, #tpu.memory_space<vmem>>, %arg7: memref<3x128xf32, #tpu.memory_space<vmem>>) attributes {dimension_semantics = [#tpu.dimension_semantics<parallel>], iteration_bounds = array<i64: 1>, scalar_prefetch = 0 : i64, scratch_operands = 0 : i64, tpu.core_type = #tpu.core_type<tc>, window_params = [{transform_indices = @transform_0, window_bounds = array<i64: 8, 128>}, {pipeline_mode = #tpu.pipeline_mode<synchronous>, transform_indices = @transform_1, window_bounds = array<i64: 16, 8>}, {pipeline_mode = #tpu.pipeline_mode<synchronous>, transform_indices = @transform_2, window_bounds = array<i64: 8, 16>}, {pipeline_mode = #tpu.pipeline_mode<synchronous>, transform_indices = @transform_3, window_bounds = array<i64: 8, 1>}, {pipeline_mode = #tpu.pipeline_mode<synchronous>, transform_indices = @transform_4, window_bounds = array<i64: 3, 8>}, {pipeline_mode = #tpu.pipeline_mode<synchronous>, transform_indices = @transform_5, window_bounds = array<i64: 3, 1>}, {transform_indices = @transform_6, window_bounds = array<i64: 3, 128>}]} {
    %c0 = arith.constant 0 : index
    %c0_0 = arith.constant 0 : index
    %0 = vector.load %arg1[%c0, %c0_0] : memref<8x128xf32, #tpu.memory_space<vmem>>, vector<8x128xf32>
    %c0_1 = arith.constant 0 : index
    %c0_2 = arith.constant 0 : index
    %1 = vector.load %arg2[%c0_1, %c0_2] : memref<16x8xf32, #tpu.memory_space<vmem>>, vector<16x8xf32>
    %cst = arith.constant dense<0.000000e+00> : vector<16x128xf32>
    %2 = tpu.matmul %1, %0, %cst {dimension_numbers = #tpu.dot_dimension_numbers<[1], [0], [0], [1], [0, 0, 1, 1], [], []>} : vector<16x8xf32>, vector<8x128xf32>, vector<16x128xf32> -> vector<16x128xf32>
    %cst_3 = arith.constant 0.000000e+00 : f32
    %3 = vector.broadcast %cst_3 : f32 to vector<16x128xf32>
    %4 = arith.maximumf %2, %3 : vector<16x128xf32>
    %c0_4 = arith.constant 0 : index
    %c0_5 = arith.constant 0 : index
    %5 = vector.load %arg3[%c0_4, %c0_5] : memref<8x16xf32, #tpu.memory_space<vmem>>, vector<8x16xf32>
    %cst_6 = arith.constant dense<0.000000e+00> : vector<8x128xf32>
    %6 = tpu.matmul %5, %4, %cst_6 {dimension_numbers = #tpu.dot_dimension_numbers<[1], [0], [0], [1], [0, 0, 1, 1], [], []>} : vector<8x16xf32>, vector<16x128xf32>, vector<8x128xf32> -> vector<8x128xf32>
    %c0_7 = arith.constant 0 : index
    %c0_8 = arith.constant 0 : index
    %7 = vector.load %arg4[%c0_7, %c0_8] : memref<8x1xf32, #tpu.memory_space<vmem>>, vector<8x1xf32>
    %8 = vector.broadcast %7 : vector<8x1xf32> to vector<8x128xf32>
    %9 = arith.addf %6, %8 : vector<8x128xf32>
    %cst_9 = arith.constant 0.000000e+00 : f32
    %10 = vector.broadcast %cst_9 : f32 to vector<8x128xf32>
    %11 = arith.maximumf %9, %10 : vector<8x128xf32>
    %c0_10 = arith.constant 0 : index
    %c0_11 = arith.constant 0 : index
    %12 = vector.load %arg5[%c0_10, %c0_11] : memref<3x8xf32, #tpu.memory_space<vmem>>, vector<3x8xf32>
    %cst_12 = arith.constant dense<0.000000e+00> : vector<3x128xf32>
    %13 = tpu.matmul %12, %11, %cst_12 {dimension_numbers = #tpu.dot_dimension_numbers<[1], [0], [0], [1], [0, 0, 1, 1], [], []>} : vector<3x8xf32>, vector<8x128xf32>, vector<3x128xf32> -> vector<3x128xf32>
    %c0_13 = arith.constant 0 : index
    %c0_14 = arith.constant 0 : index
    %14 = vector.load %arg6[%c0_13, %c0_14] : memref<3x1xf32, #tpu.memory_space<vmem>>, vector<3x1xf32>
    %15 = vector.broadcast %14 : vector<3x1xf32> to vector<3x128xf32>
    %16 = arith.addf %13, %15 : vector<3x128xf32>
    %17 = arith.negf %16 : vector<3x128xf32>
    %18 = math.exp %17 : vector<3x128xf32>
    %cst_15 = arith.constant 1.000000e+00 : f32
    %19 = vector.broadcast %cst_15 : f32 to vector<3x128xf32>
    %20 = arith.addf %19, %18 : vector<3x128xf32>
    %21 = arith.divf %19, %20 : vector<3x128xf32>
    %c0_16 = arith.constant 0 : index
    %c0_17 = arith.constant 0 : index
    %22 = vector.load %arg7[%c0_16, %c0_17] : memref<3x128xf32, #tpu.memory_space<vmem>>, vector<3x128xf32>
    tpu.vector_store %arg7[%c0_16, %c0_17], %21 {strides = array<i32>} : memref<3x128xf32, #tpu.memory_space<vmem>>, vector<3x128xf32>,
    return
  }
  func.func @transform_0(%arg0: i32) -> (i32, i32) {
    %c0_i32 = arith.constant 0 : i32
    %c0_i32_0 = arith.constant 0 : i32
    return %c0_i32, %arg0 : i32, i32
  }
  func.func @transform_1(%arg0: i32) -> (i32, i32) {
    %c0_i32 = arith.constant 0 : i32
    %c0_i32_0 = arith.constant 0 : i32
    %c0_i32_1 = arith.constant 0 : i32
    return %c0_i32, %c0_i32_0 : i32, i32
  }
  func.func @transform_2(%arg0: i32) -> (i32, i32) {
    %c0_i32 = arith.constant 0 : i32
    %c0_i32_0 = arith.constant 0 : i32
    %c0_i32_1 = arith.constant 0 : i32
    return %c0_i32, %c0_i32_0 : i32, i32
  }
  func.func @transform_3(%arg0: i32) -> (i32, i32) {
    %c0_i32 = arith.constant 0 : i32
    %c0_i32_0 = arith.constant 0 : i32
    %c0_i32_1 = arith.constant 0 : i32
    return %c0_i32, %c0_i32_0 : i32, i32
  }
  func.func @transform_4(%arg0: i32) -> (i32, i32) {
    %c0_i32 = arith.constant 0 : i32
    %c0_i32_0 = arith.constant 0 : i32
    %c0_i32_1 = arith.constant 0 : i32
    return %c0_i32, %c0_i32_0 : i32, i32
  }
  func.func @transform_5(%arg0: i32) -> (i32, i32) {
    %c0_i32 = arith.constant 0 : i32
    %c0_i32_0 = arith.constant 0 : i32
    %c0_i32_1 = arith.constant 0 : i32
    return %c0_i32, %c0_i32_0 : i32, i32
  }
  func.func @transform_6(%arg0: i32) -> (i32, i32) {
    %c0_i32 = arith.constant 0 : i32
    %c0_i32_0 = arith.constant 0 : i32
    return %c0_i32, %arg0 : i32, i32
  }
}

</mosaic_0001>

<bundles_post_ra>
// kernel: tpu_custom_call.1
= control target key start
LH: loop header
LB: loop body
LE: loop exit
PB: predicated region body
PF: predicated region fallthrough
CT: control target
= control target key end

     0   :  { %vm27_vm0 = vcmask 64512   ;;  %s260_s0 = inlined_call_operand.vmem [shape: f32[8,128], index: 0, kind: input, shape index: {}]   ;;  %s261_s1 = inlined_call_operand.vmem [shape: f32[16,8], index: 1, kind: input, shape index: {}]   ;;  %s262_s2 = inlined_call_operand.vmem [shape: f32[8,16], index: 2, kind: input, shape index: {}]   ;;  %s263_s3 = inlined_call_operand.vmem [shape: f32[8,1], index: 3, kind: input, shape index: {}]   ;;  %s264_s4 = inlined_call_operand.vmem [shape: f32[3,8], index: 4, kind: input, shape index: {}]   ;;  %s265_s5 = inlined_call_operand.vmem [shape: f32[3,1], index: 5, kind: input, shape index: {}]   ;;  %s266_s6 = inlined_call_operand.hbm [shape: f32[3,128], index: 6, kind: output, shape index: {}]  }
   0x1   :  { %v24_v0 = vld [vmem:[%s260_s0] sm:$0xff]  ;;  %v26_v1 = vld [vmem:[%s261_s1 + $0x8] sm:$0xff] }
   0x2   :  { %v25_v2 = vld [vmem:[%s261_s1] sm:$0xff]  ;;  %162 = vmatpush.msra.mxu3 %v24_v0  ;;  %49 = vmatpush.msra.mxu0 %v24_v0 }
   0x3   :  { %11 = vsyncpa [#allocation3], 0  ;;  %158 = vmatmul.msk.f32.vlgmr.msra.gmra.mxu3 %vm27_vm0, %v26_v1  ;;  %157 = vmatmul.msk.f32.vlgmr.msra.gmra.mxu0 %vm27_vm0, %v25_v2  ;;  %v60_v3 = vld [vmem:[%s263_s3] sm:$0xff]  ;;  %v196_v4 = vmov 0   ;;  %vm66_vm1 = vcmask 130048   ;;  %s148_s9 = sshll.u32 %s266_s6, 4  ;;  %s149_s9 = int_to_ptr.hbm [resolvable:$true] %s148_s9 }
   0x4   :  { %165 = vset.pattern.permute.xlu0 %v196_v4  ;;  %v92_v5 = vld [vmem:[%s265_s5] sm:$0x7] }
   0x5   :  { %63 = vperm.xlu0 %165, %v60_v3   ;;  %v59_v10 = vld [vmem:[%s262_s2] sm:$0xff]  ;;  %s197_s2 = smov [#allocation2]  }
   0x6   :  { %v91_v15 = vld [vmem:[%s264_s4] sm:$0x7]  ;;  %s146_s4 = sshll.u32 %s197_s2, 4  ;;  %s147_s4 = int_to_ptr.vmem [resolvable:$true] %s146_s4 }
   0xd   :  { %95 = vperm.xlu0 %165, %v92_v5  }
  0x77   :  { %v64_v11 = vpop.permute.xlu0 %63 }
  0x7f   :  { %v96_v16 = vpop.permute.xlu0 %95 }
  0x80   :  { %v51_v6 = vpop.f32.mrf.mxu0 }
  0x81   :  { %v57_v9 = vmax.f32 %v51_v6, 0.0 }
  0x86   :  { %v54_v7 = vpop.f32.mrf.mxu3 }
  0x87   :  { %v58_v8 = vmax.f32 %v54_v7, 0.0 }
  0x89   :  { %84 = vmatpush.msra.mxu1 %v58_v8 }
  0x8b   :  { %85 = vmatpush.msra.mxu1 %v57_v9 }
  0x8c   :  { %159 = vmatmul.msk.f32.vlgmr.msra.gmra.mxu1 %vm66_vm1, %v59_v10 }
 0x109   :  { %v87_v12 = vpop.f32.mrf.mxu1 }
 0x10a   :  { %v88_v13 = vadd.f32 %v87_v12, %v64_v11 }
 0x10c   :  { %v90_v14 = vmax.f32 %v88_v13, 0.0 }
 0x10e   :  { %116 = vmatpush.msra.mxu2 %v90_v14 }
 0x10f   :  { %160 = vmatmul.msk.f32.vlgmr.msra.gmra.mxu2 %vm27_vm0, %v91_v15 }
 0x192   :  { %v118_v17 = vpop.f32.mrf.mxu2 }
 0x193   :  { %v119_v18 = vadd.f32 %v118_v17, %v96_v16 }
 0x195   :  { %v161_v19 = vmul.f32 -1.442695, %v119_v18 }
 0x197   :  { %166 = vpow2.f32 %v161_v19 }
 0x19d   :  { %v167_v20 = vpop.eup %166 }
 0x19e   :  { %v124_v21 = vadd.f32 1.0, %v167_v20 }
 0x1a0   :  { %168 = vrcp.f32 %v124_v21  ;;  %v136_v25 = vand.u32 2147483648, %v124_v21  ;;  %v134_v27 = vand.u32 2147483647, %v124_v21  ;;  %vm130_vm3 = vweird.f32 %v124_v21 }
 0x1a2   :  { %v137_v29 = vor.u32 1.1754944e-38, %v136_v25  ;;  %vm135_vm5 = vcmp.eq.f32.partialorder %v134_v27, 8.507059e+37 }
 0x1a6   :  { %v169_v22 = vpop.eup %168 }
 0x1a7   :  { %v126_v23 = vmul.f32 %v169_v22, %v124_v21  ;;  %vm131_vm2 = vweird.f32 %v169_v22 }
 0x1a8   :  { %vm132_vm4 = vmor %vm130_vm3, %vm131_vm2 }
 0x1a9   :  { %v127_v24 = vsub.f32 1.0, %v126_v23 }
 0x1ab   :  { %v128_v26 = vmul.f32 %v169_v22, %v127_v24 }
 0x1ad   :  { %v129_v28 = vadd.f32 %v169_v22, %v128_v26 }
 0x1af   :  { %v133_v30 = vsel %vm132_vm4, %v169_v22, %v129_v28 }
 0x1b0   :  { %v138_v31 = vsel %vm135_vm5, %v137_v29, %v133_v30 }
 0x1b1   :  { %140 = vst [vmem:[#allocation2] sm:$0x7] %v138_v31 }
 0x1b2   :  { %151 = dma.vmem_to_hbm [thread:$0]  %s147_s4, 64, %s149_s9, [#allocation3]  }
 0x1b3   :  { %194 = dma.done.wait [#allocation3], 64  }
 0x1b4   :  { %195 = vsyncadd [#allocation3], 4294967232 }
 0x1b5   :  { %156 = vsyncpa [#allocation3], 1 }

</bundles_post_ra>
